<compile_context>
chip_gen: v7x
topology: tpu7x:2x2x1
jax: 0.10.0
libtpu: 0.0.40
codegen_flags: <defaults>
</compile_context>

<pallas_src>
import random

import jax
import jax.numpy as jnp
from jax.experimental import pallas as pl
from jax.experimental.pallas import tpu as pltpu

NUM_TRANSFORMS = 3  # fixed synthetic transform bank: [Gain, PolarityInversion, DCOffset]


def _someof_kernel(so_ref, x_ref, o_ref):
    """Apply the folded affine transform chain to one tile.

    so_ref: SMEM float32[2] -- [scale, offset]  (precomputed on host from the
                                selected transform chain, in application order)
    x_ref:  VMEM [R_tile, T_tile]
    o_ref:  VMEM [R_tile, T_tile]
    """
    scale = so_ref[0]
    offset = so_ref[1]
    x = x_ref[...]
    o_ref[...] = (x * scale + offset).astype(o_ref.dtype)


def _round_up(x: int, m: int) -> int:
    return ((x + m - 1) // m) * m


def _apply_someof(samples: jnp.ndarray, scale: float, offset: float) -> jnp.ndarray:
    """Run `out = samples * scale + offset` through a tiled Pallas kernel."""
    B, C, T = samples.shape
    R = B * C
    x2 = samples.reshape(R, T)

    itemsize = jnp.dtype(samples.dtype).itemsize
    # sublane multiple for the row axis (f32 -> 8, bf16 -> 16, int8/fp8 -> 32)
    sublane = {4: 8, 2: 16, 1: 32}.get(itemsize, 8)

    # Pad so block shapes can satisfy the (sublane, 128) divisibility rule.
    Rp = _round_up(R, sublane)
    Tp = _round_up(T, 128)
    if (Rp, Tp) != (R, T):
        x2 = jnp.pad(x2, ((0, Rp - R), (0, Tp - T)))

    # Tile sizes: big enough to hit the HBM roofline, small enough that
    # 2 arrays x 2 pipeline buffers x tile stays well under the 32 MiB scoped
    # VMEM default on all of v5e/v6e/v7x (512x1024 f32 tile = 2 MiB -> 8 MiB total).
    r_tile = min(Rp, 512)
    t_tile = min(Tp, 1024)
    grid = (pl.cdiv(Rp, r_tile), pl.cdiv(Tp, t_tile))

    scale_offset = jnp.array([scale, offset], dtype=jnp.float32)

    out = pl.pallas_call(
        _someof_kernel,
        out_shape=jax.ShapeDtypeStruct((Rp, Tp), samples.dtype),
        grid=grid,
        in_specs=[
            pl.BlockSpec(memory_space=pltpu.MemorySpace.SMEM),        # [scale, offset]
            pl.BlockSpec((r_tile, t_tile), lambda i, j: (i, j)),      # samples tile
        ],
        out_specs=pl.BlockSpec((r_tile, t_tile), lambda i, j: (i, j)),
        # Pure elementwise update: let XLA alias/donate the input buffer when it can.
        input_output_aliases={1: 0},
        compiler_params=pltpu.CompilerParams(
            dimension_semantics=("parallel", "parallel"),  # megacore sharding on v7x
        ),
        cost_estimate=pl.CostEstimate(
            flops=2 * Rp * Tp,
            transcendentals=0,
            bytes_accessed=2 * Rp * Tp * itemsize,
        ),
    )(scale_offset, x2)

    if (Rp, Tp) != (R, T):
        out = out[:R, :T]
    return out.reshape(B, C, T)


class SomeOf:
    """JAX/Pallas port of the SomeOf compose over a fixed synthetic transform bank."""

    def __init__(self, num_transforms, p: float = 1.0):
        self.p = p
        self.are_parameters_frozen = False
        self.transform_indexes = []
        self.num_transforms = num_transforms
        self.all_transforms_indexes = list(range(NUM_TRANSFORMS))
        if isinstance(num_transforms, tuple):
            self.min_num_transforms = num_transforms[0]
            self.max_num_transforms = (
                num_transforms[1] if num_transforms[1] else NUM_TRANSFORMS
            )
        else:
            self.min_num_transforms = self.max_num_transforms = num_transforms
        assert self.min_num_transforms >= 1
        assert self.min_num_transforms <= NUM_TRANSFORMS
        assert self.max_num_transforms <= NUM_TRANSFORMS

        # Deterministic synthetic transform parameters (gain factor, dc offset).
        self.gain_factor = 0.5
        self.dc_offset = 0.1

    def randomize_parameters(self) -> None:
        n = random.randint(self.min_num_transforms, self.max_num_transforms)
        self.transform_indexes = sorted(
            random.sample(self.all_transforms_indexes, n)
        )

    def freeze_parameters(self, seed: int = 0) -> None:
        # TODO(synk): seed is accepted for API parity; per-transform reseeding has no
        # equivalent here since the synthetic transform parameters are deterministic.
        self.are_parameters_frozen = True

    def unfreeze_parameters(self) -> None:
        self.are_parameters_frozen = False

    def forward(self, samples=None, sample_rate=None):
        selected = [False] * NUM_TRANSFORMS
        if random.random() < self.p:
            if not self.are_parameters_frozen:
                self.randomize_parameters()
            for i in self.transform_indexes:
                selected[i] = True

        # Fold the sorted chain [Gain, PolarityInversion, DCOffset] into one affine op.
        scale = 1.0
        if selected[0]:
            scale *= self.gain_factor       # transform 0: Gain
        if selected[1]:
            scale *= -1.0                   # transform 1: PolarityInversion
        offset = self.dc_offset if selected[2] else 0.0  # transform 2: DC offset

        if scale == 1.0 and offset == 0.0:
            # Nothing selected (or identity chain): skip the HBM round trip entirely.
            return {"samples": samples, "sample_rate": sample_rate}

        out = _apply_someof(samples, scale, offset)
        # ObjectDict equivalent
        return {"samples": out, "sample_rate": sample_rate}

    __call__ = forward


if __name__ == "__main__":
    # Deterministic host-side selection randomness (mirrors Python `random` in torch module).
    random.seed(0)

    key = jax.random.PRNGKey(0)
    batch, channels, time = 2, 4, 128
    samples = jax.random.normal(key, (batch, channels, time), dtype=jnp.float32)

    compose = SomeOf((1, 3), p=1.0)
    result = compose(samples=samples, sample_rate=16000)
    out = jax.block_until_ready(result["samples"])

    assert out.shape == (batch, channels, time)
    assert out.dtype == jnp.float32

    # Host-side reference for the selected chain (same fold: out = x*scale + offset).
    sel = [i in compose.transform_indexes for i in range(NUM_TRANSFORMS)]
    ref = samples
    if sel[0]:
        ref = ref * compose.gain_factor
    if sel[1]:
        ref = -ref
    if sel[2]:
        ref = ref + compose.dc_offset
    assert jnp.allclose(out, ref, atol=1e-6)

    print("KERNEL_OK")
</pallas_src>

<mosaic_0001>
module attributes {stable_mosaic.version = 11 : i64} {
  func.func @_someof_kernel(%arg0: i32, %arg1: i32, %arg2: memref<2xf32, #tpu.memory_space<smem>>, %arg3: memref<8x128xf32, #tpu.memory_space<vmem>>, %arg4: memref<8x128xf32, #tpu.memory_space<vmem>>) attributes {dimension_semantics = [#tpu.dimension_semantics<parallel>, #tpu.dimension_semantics<parallel>], iteration_bounds = array<i64: 1, 1>, scalar_prefetch = 0 : i64, scratch_operands = 0 : i64, tpu.core_type = #tpu.core_type<tc>, window_params = [{transform_indices = @transform_0, window_bounds = array<i64: 2>}, {transform_indices = @transform_1, window_bounds = array<i64: 8, 128>}, {transform_indices = @transform_2, window_bounds = array<i64: 8, 128>}]} {
    %c0 = arith.constant 0 : index
    %0 = memref.load %arg2[%c0] : memref<2xf32, #tpu.memory_space<smem>>
    %c1 = arith.constant 1 : index
    %1 = memref.load %arg2[%c1] : memref<2xf32, #tpu.memory_space<smem>>
    %c0_0 = arith.constant 0 : index
    %c0_1 = arith.constant 0 : index
    %2 = vector.load %arg3[%c0_0, %c0_1] : memref<8x128xf32, #tpu.memory_space<vmem>>, vector<8x128xf32>
    %3 = vector.broadcast %0 : f32 to vector<8x128xf32>
    %4 = arith.mulf %2, %3 : vector<8x128xf32>
    %5 = vector.broadcast %1 : f32 to vector<8x128xf32>
    %6 = arith.addf %4, %5 : vector<8x128xf32>
    %c0_2 = arith.constant 0 : index
    %c0_3 = arith.constant 0 : index
    %7 = vector.load %arg4[%c0_2, %c0_3] : memref<8x128xf32, #tpu.memory_space<vmem>>, vector<8x128xf32>
    tpu.vector_store %arg4[%c0_2, %c0_3], %6 {strides = array<i32>} : memref<8x128xf32, #tpu.memory_space<vmem>>, vector<8x128xf32>,
    return
  }
  func.func @transform_0(%arg0: i32, %arg1: i32) -> i32 {
    %c0_i32 = arith.constant 0 : i32
    %c0_i32_0 = arith.constant 0 : i32
    return %c0_i32 : i32
  }
  func.func @transform_1(%arg0: i32, %arg1: i32) -> (i32, i32) {
    %c0_i32 = arith.constant 0 : i32
    return %arg0, %arg1 : i32, i32
  }
  func.func @transform_2(%arg0: i32, %arg1: i32) -> (i32, i32) {
    %c0_i32 = arith.constant 0 : i32
    return %arg0, %arg1 : i32, i32
  }
}

</mosaic_0001>

<bundles_post_ra>
// kernel: tpu_custom_call.1
= control target key start
LH: loop header
LB: loop body
LE: loop exit
PB: predicated region body
PF: predicated region fallthrough
CT: control target
= control target key end

     0   :  { %7 = vsyncpa [#allocation5], 0  ;;  %s172_s0 = inlined_call_operand.vmem [shape: f32[2], index: 0, kind: input, shape index: {}]   ;;  %s173_s1 = inlined_call_operand.hbm [shape: f32[8,128], index: 1, kind: input, shape index: {}, may-alias: {1,2}]   ;;  %s174_s2 = inlined_call_operand.hbm [shape: f32[8,128], index: 2, kind: output, shape index: {}, may-alias: {1,2}]  }
   0x1   :  { %8 = vsyncpa [#allocation3], 0 }
   0x2   :  { %9 = vsyncpa [#allocation4], 0  ;;  %s16_s11 = sshll.u32 %s172_s0, 4  ;;  %s17_s11 = int_to_ptr.vmem [resolvable:$true] %s16_s11 }
   0x3   :  { %s65_s12 = scalar_lea.vmem %s17_s11, 16  ;;  %p70_p1 = scmp.lt.s32.totalorder %s17_s11, %s17_s11 }
   0x4   :  { %p66_p0 = scmp.ne.s32.totalorder %s17_s11, %s65_s12  ;;  %p71_p2 = scmp.lt.s32.totalorder %s65_s12, %s65_s12 }
   0x6   :  { %p72_p3 = por %p71_p2, %p70_p1 }
   0x8   :  { %p73_p4 = pnand %p72_p3, %p66_p0 }
   0xa   :  { %76 = shalt.err (!%p73_p4)
}
   0xb   :  { %s127_s13 = smov [#allocation2]   ;;  %s128_s14 = smov [#allocation6]  }
   0xc   :  { %19 = dma.vmem_to_smem %s17_s11, 16, %s127_s13, [#allocation5]  }
   0xd   :  { %s26_s15 = sshll.u32 %s128_s14, 4  ;;  %s77_s18 = scalar_lea.hbm %s173_s1, 128  ;;  %s27_s15 = int_to_ptr.vmem [resolvable:$true] %s26_s15 }
   0xe   :  { %p78_p5 = scmp.ne.s32.totalorder %s173_s1, %s77_s18  ;;  %p81_p6 = scmp.lt.u32.totalorder %s77_s18, %s173_s1 }
  0x10   :  { %p83_p7 = pnand %p81_p6, %p78_p5 }
  0x12   :  { %86 = shalt.err (!%p83_p7)
}
  0x13   :  { %s87_s22 = scalar_lea.vmem %s27_s15, 128  ;;  %p92_p9 = scmp.lt.s32.totalorder %s27_s15, %s27_s15 }
  0x14   :  { %p88_p8 = scmp.ne.s32.totalorder %s27_s15, %s87_s22  ;;  %p93_p10 = scmp.lt.s32.totalorder %s87_s22, %s87_s22 }
  0x16   :  { %p94_p11 = por %p93_p10, %p92_p9 }
  0x18   :  { %p95_p12 = pnand %p94_p11, %p88_p8 }
  0x1a   :  { %98 = shalt.err (!%p95_p12)
}
  0x1b   :  { %29 = dma.hbm_to_vmem [thread:$0]  %s173_s1, 128, %s27_s15, [#allocation3]  }
  0x1c   :  { %121 = dma.done.wait [#allocation5], 16  }
  0x1d   :  { %122 = vsyncadd [#allocation5], 4294967280 }
  0x1e   :  { %123 = dma.done.wait [#allocation3], 128  }
  0x1f   :  { %124 = vsyncadd [#allocation3], 4294967168 }
  0x20   :  { %36 = sfence }
  0x21   :  { %s37_s25 = sld [smem:[#allocation2]]  ;;  %s61_s26 = sld [smem:[#allocation2 + $0x1]]  ;;  %v39_v0 = vld [vmem:[#allocation6] sm:$0xff] }
  0x22   :  { %s129_s27 = smov [#allocation7]  }
  0x23   :  { %s51_s28 = sshll.u32 %s129_s27, 4  ;;  %s52_s28 = int_to_ptr.vmem [resolvable:$true] %s51_s28 }
  0x24   :  { %s99_s29 = scalar_lea.vmem %s52_s28, 128  ;;  %p104_p0 = scmp.lt.s32.totalorder %s52_s28, %s52_s28 }
  0x25   :  { %p100_p13 = scmp.ne.s32.totalorder %s52_s28, %s99_s29  ;;  %p105_p1 = scmp.lt.s32.totalorder %s99_s29, %s99_s29 }
  0x27   :  { %v40_v1 = vstv %s37_s25  ;;  %v42_v2 = vstv %s61_s26  ;;  %p106_p2 = por %p105_p1, %p104_p0 }
  0x28   :  { %v41_v3 = vmul.f32 %v40_v1, %v39_v0 }
  0x29   :  { %p107_p3 = pnand %p106_p2, %p100_p13 }
  0x2a   :  { %v43_v4 = vadd.f32 %v42_v2, %v41_v3 }
  0x2c   :  { %44 = vst [vmem:[#allocation7] sm:$0xff] %v43_v4 }
  0x2d   :  { %110 = shalt.err (!%p107_p3)
}
  0x2e   :  { %s111_s3 = scalar_lea.hbm %s174_s2, 128 }
  0x2f   :  { %p112_p4 = scmp.ne.s32.totalorder %s174_s2, %s111_s3  ;;  %p115_p5 = scmp.lt.u32.totalorder %s111_s3, %s174_s2 }
  0x31   :  { %p117_p6 = pnand %p115_p5, %p112_p4 }
  0x33   :  { %120 = shalt.err (!%p117_p6)
}
  0x34   :  { %54 = dma.vmem_to_hbm [thread:$0]  %s52_s28, 128, %s174_s2, [#allocation4]  }
  0x35   :  { %125 = dma.done.wait [#allocation4], 128  }
  0x36   :  { %126 = vsyncadd [#allocation4], 4294967168 }
  0x37   :  { %58 = vsyncpa [#allocation3], 1 }
  0x38   :  { %59 = vsyncpa [#allocation4], 1 }
  0x39   :  { %60 = vsyncpa [#allocation5], 1 }

</bundles_post_ra>
